<compile_context>
chip_gen: v7x
topology: tpu7x:2x2x1
jax: 0.10.0
libtpu: 0.0.40
codegen_flags: <defaults>
</compile_context>

<pallas_src>
import jax
import jax.numpy as jnp
from jax.experimental import pallas as pl
from jax.experimental.pallas import tpu as pltpu

LANE = 128
SUBLANE = 8


def _round_up(n, m):
    return ((n + m - 1) // m) * m


def vae_kernel(x_ref, eps_ref, w1_ref, wml_ref, w2_ref, w3_ref, b_ref,
               recon_ref, ml_ref):
    """One batch tile of Encoder -> reparameterization -> Decoder.

    Feature dims are pre-padded to 128-lane multiples (padding columns/rows are zero),
    so results in the padded lanes are exactly zero and all stores are full-lane vst.
    """
    Hp = w1_ref.shape[1]
    L2p = wml_ref.shape[1]
    Lp = L2p // 2
    Dp = w3_ref.shape[1]

    # Slice the packed-bias ref directly (only the lanes we need are loaded).
    b1 = b_ref[0:1, :Hp]
    bml = b_ref[1:2, :L2p]
    b2 = b_ref[2:3, :Hp]
    b3 = b_ref[3:4, :Dp]

    x = x_ref[...]                    # (TB, Dp) f32

    # ---- Encoder ----
    h = jnp.dot(x.astype(jnp.bfloat16), w1_ref[...],
                preferred_element_type=jnp.float32) + b1
    h = jnp.maximum(h, 0.0)
    # Fused mu||logvar head: one (Hp, 2*Lp) matmul instead of two (Hp, Lp) matmuls.
    ml = jnp.dot(h.astype(jnp.bfloat16), wml_ref[...],
                 preferred_element_type=jnp.float32) + bml
    mu = ml[:, :Lp]                   # 128-aligned slices -> no cross-tile copies
    logvar = ml[:, Lp:]

    # ---- Reparameterization: z = mu + exp(0.5 * logvar) * eps  (exp on the EUP slot) ----
    z = mu + jnp.exp(0.5 * logvar) * eps_ref[...]

    # ---- Decoder ----
    d = jnp.dot(z.astype(jnp.bfloat16), w2_ref[...],
                preferred_element_type=jnp.float32) + b2
    d = jnp.maximum(d, 0.0)
    logits = jnp.dot(d.astype(jnp.bfloat16), w3_ref[...],
                     preferred_element_type=jnp.float32) + b3
    # sigmoid = 1 / (1 + exp(-x)); exp + approximate reciprocal both run in the EUP slot.
    recon = pl.reciprocal(1.0 + jnp.exp(-logits), approx=True)

    recon_ref[...] = recon.astype(recon_ref.dtype)
    ml_ref[...] = ml.astype(ml_ref.dtype)


def vae_forward(x, eps, params, *, batch_tile=256):
    """x: (B, D) f32 input, eps: (B, L) f32 standard-normal noise.

    Returns (recon, mu, logvar) with logical (unpadded) shapes.
    """
    B, D = x.shape
    H = params["w1"].shape[1]
    L = params["wmu"].shape[1]

    Dp = _round_up(D, LANE)
    Hp = _round_up(H, LANE)
    Lp = _round_up(L, LANE)
    L2p = 2 * Lp
    maxp = max(Hp, L2p, Dp)

    # Batch tile: at least 8 sublanes, at most the (sublane-padded) batch.
    tb = min(_round_up(batch_tile, SUBLANE), _round_up(B, SUBLANE))
    Bp = _round_up(B, tb)

    f32 = jnp.float32
    bf16 = jnp.bfloat16

    def pad2(a, rows, cols):
        return jnp.pad(a, ((0, rows - a.shape[0]), (0, cols - a.shape[1])))

    # One-time packing: bf16 weights, fused mu/logvar head, stacked biases.
    w1 = pad2(params["w1"], Dp, Hp).astype(bf16)
    wml = jnp.concatenate([pad2(params["wmu"], Hp, Lp),
                           pad2(params["wlv"], Hp, Lp)], axis=1).astype(bf16)
    w2 = pad2(params["w2"], Lp, Hp).astype(bf16)
    w3 = pad2(params["w3"], Hp, Dp).astype(bf16)

    def padb(b):
        b = b.reshape(1, -1).astype(f32)
        return jnp.pad(b, ((0, 0), (0, maxp - b.shape[1])))

    bml = jnp.concatenate([params["bmu"].reshape(1, -1).astype(f32),
                           jnp.zeros((1, Lp - L), f32),
                           params["blv"].reshape(1, -1).astype(f32)], axis=1)
    bstack = jnp.concatenate([padb(params["b1"]), padb(bml),
                              padb(params["b2"]), padb(params["b3"])], axis=0)

    xp = jnp.pad(x.astype(f32), ((0, Bp - B), (0, Dp - D)))
    epsp = jnp.pad(eps.astype(f32), ((0, Bp - B), (0, Lp - L)))

    recon_p, ml_p = pl.pallas_call(
        vae_kernel,
        out_shape=(jax.ShapeDtypeStruct((Bp, Dp), f32),
                   jax.ShapeDtypeStruct((Bp, L2p), f32)),
        grid_spec=pltpu.PrefetchScalarGridSpec(
            num_scalar_prefetch=0,
            grid=(Bp // tb,),
            in_specs=[
                pl.BlockSpec((tb, Dp), lambda i: (i, 0)),    # x tile
                pl.BlockSpec((tb, Lp), lambda i: (i, 0)),    # eps tile
                pl.BlockSpec((Dp, Hp), lambda i: (0, 0)),    # w1   (VMEM-resident)
                pl.BlockSpec((Hp, L2p), lambda i: (0, 0)),   # fused mu||logvar head
                pl.BlockSpec((Lp, Hp), lambda i: (0, 0)),    # w2
                pl.BlockSpec((Hp, Dp), lambda i: (0, 0)),    # w3
                pl.BlockSpec((4, maxp), lambda i: (0, 0)),   # packed biases (full extent)
            ],
            out_specs=(
                pl.BlockSpec((tb, Dp), lambda i: (i, 0)),    # recon tile (lane-dense)
                pl.BlockSpec((tb, L2p), lambda i: (i, 0)),   # mu||logvar tile (lane-dense)
            ),
        ),
        compiler_params=pltpu.CompilerParams(
            dimension_semantics=("parallel",),               # shard batch grid across TCs
        ),
    )(xp, epsp, w1, wml, w2, w3, bstack)

    recon = recon_p[:B, :D]
    mu = ml_p[:B, :L]
    logvar = ml_p[:B, Lp:Lp + L]
    return recon, mu, logvar


def vae_reference(x, eps, params):
    """Pure-JAX f32 reference of the same forward pass."""
    h = jnp.maximum(x @ params["w1"] + params["b1"], 0.0)
    mu = h @ params["wmu"] + params["bmu"]
    logvar = h @ params["wlv"] + params["blv"]
    z = mu + jnp.exp(0.5 * logvar) * eps
    d = jnp.maximum(z @ params["w2"] + params["b2"], 0.0)
    recon = jax.nn.sigmoid(d @ params["w3"] + params["b3"])
    return recon, mu, logvar


def init_params(key, D, H, L):
    ks = jax.random.split(key, 6)
    scale = 0.05
    return {
        "w1": scale * jax.random.normal(ks[0], (D, H), jnp.float32),
        "b1": jnp.zeros((1, H), jnp.float32),
        "wmu": scale * jax.random.normal(ks[1], (H, L), jnp.float32),
        "bmu": jnp.zeros((1, L), jnp.float32),
        "wlv": scale * jax.random.normal(ks[2], (H, L), jnp.float32),
        "blv": jnp.zeros((1, L), jnp.float32),
        "w2": scale * jax.random.normal(ks[3], (L, H), jnp.float32),
        "b2": jnp.zeros((1, H), jnp.float32),
        "w3": scale * jax.random.normal(ks[4], (H, D), jnp.float32),
        "b3": jnp.zeros((1, D), jnp.float32),
    }


if __name__ == "__main__":
    B, D, H, L = 8, 64, 32, 16  # batch, input dim (flattened image), hidden, latent

    key = jax.random.PRNGKey(0)
    kx, keps, kp = jax.random.split(key, 3)

    x = jax.random.uniform(kx, (B, D), jnp.float32)        # "input"
    eps = jax.random.normal(keps, (B, L), jnp.float32)     # randn_like for reparam trick
    params = init_params(kp, D, H, L)

    recon, mu, logvar = jax.block_until_ready(jax.jit(vae_forward)(x, eps, params))

    assert recon.shape == (B, D)
    assert mu.shape == (B, L)
    assert logvar.shape == (B, L)
    assert bool(jnp.all(jnp.isfinite(recon)))

    # bf16 matmuls + approximate reciprocal -> loose tolerance vs f32 reference.
    r_ref, m_ref, lv_ref = vae_reference(x, eps, params)
    assert float(jnp.max(jnp.abs(recon - r_ref))) < 5e-2
    assert float(jnp.max(jnp.abs(mu - m_ref))) < 5e-2
    assert float(jnp.max(jnp.abs(logvar - lv_ref))) < 5e-2

    print("KERNEL_OK")
</pallas_src>

<mosaic_0001>
module attributes {stable_mosaic.version = 11 : i64} {
  func.func @vae_kernel(%arg0: i32, %arg1: memref<8x128xf32, #tpu.memory_space<vmem>>, %arg2: memref<8x128xf32, #tpu.memory_space<vmem>>, %arg3: memref<128x128xbf16, #tpu.memory_space<vmem>>, %arg4: memref<128x256xbf16, #tpu.memory_space<vmem>>, %arg5: memref<128x128xbf16, #tpu.memory_space<vmem>>, %arg6: memref<128x128xbf16, #tpu.memory_space<vmem>>, %arg7: memref<4x256xf32, #tpu.memory_space<vmem>>, %arg8: memref<8x128xf32, #tpu.memory_space<vmem>>, %arg9: memref<8x256xf32, #tpu.memory_space<vmem>>) attributes {dimension_semantics = [#tpu.dimension_semantics<parallel>], iteration_bounds = array<i64: 1>, scalar_prefetch = 0 : i64, scratch_operands = 0 : i64, tpu.core_type = #tpu.core_type<tc>, window_params = [{transform_indices = @transform_0, window_bounds = array<i64: 8, 128>}, {transform_indices = @transform_1, window_bounds = array<i64: 8, 128>}, {pipeline_mode = #tpu.pipeline_mode<synchronous>, transform_indices = @transform_2, window_bounds = array<i64: 128, 128>}, {pipeline_mode = #tpu.pipeline_mode<synchronous>, transform_indices = @transform_3, window_bounds = array<i64: 128, 256>}, {pipeline_mode = #tpu.pipeline_mode<synchronous>, transform_indices = @transform_4, window_bounds = array<i64: 128, 128>}, {pipeline_mode = #tpu.pipeline_mode<synchronous>, transform_indices = @transform_5, window_bounds = array<i64: 128, 128>}, {pipeline_mode = #tpu.pipeline_mode<synchronous>, transform_indices = @transform_6, window_bounds = array<i64: 4, 256>}, {transform_indices = @transform_7, window_bounds = array<i64: 8, 128>}, {transform_indices = @transform_8, window_bounds = array<i64: 8, 256>}]} {
    %c0 = arith.constant 0 : index
    %c0_0 = arith.constant 0 : index
    %0 = vector.load %arg7[%c0, %c0_0] : memref<4x256xf32, #tpu.memory_space<vmem>>, vector<1x128xf32>
    %c1 = arith.constant 1 : index
    %c0_1 = arith.constant 0 : index
    %1 = vector.load %arg7[%c1, %c0_1] : memref<4x256xf32, #tpu.memory_space<vmem>>, vector<1x256xf32>
    %c2 = arith.constant 2 : index
    %c0_2 = arith.constant 0 : index
    %2 = vector.load %arg7[%c2, %c0_2] : memref<4x256xf32, #tpu.memory_space<vmem>>, vector<1x128xf32>
    %c3 = arith.constant 3 : index
    %c0_3 = arith.constant 0 : index
    %3 = vector.load %arg7[%c3, %c0_3] : memref<4x256xf32, #tpu.memory_space<vmem>>, vector<1x128xf32>
    %c0_4 = arith.constant 0 : index
    %c0_5 = arith.constant 0 : index
    %4 = vector.load %arg1[%c0_4, %c0_5] : memref<8x128xf32, #tpu.memory_space<vmem>>, vector<8x128xf32>
    %5 = arith.truncf %4 : vector<8x128xf32> to vector<8x128xbf16>
    %c0_6 = arith.constant 0 : index
    %c0_7 = arith.constant 0 : index
    %6 = vector.load %arg3[%c0_6, %c0_7] : memref<128x128xbf16, #tpu.memory_space<vmem>>, vector<128x128xbf16>
    %cst = arith.constant dense<0.000000e+00> : vector<8x128xf32>
    %7 = tpu.matmul %5, %6, %cst {dimension_numbers = #tpu.dot_dimension_numbers<[1], [0], [0], [1], [0, 0, 1, 1], [], []>} : vector<8x128xbf16>, vector<128x128xbf16>, vector<8x128xf32> -> vector<8x128xf32>
    %8 = vector.broadcast %0 : vector<1x128xf32> to vector<8x128xf32>
    %9 = arith.addf %7, %8 : vector<8x128xf32>
    %cst_8 = arith.constant 0.000000e+00 : f32
    %10 = vector.broadcast %cst_8 : f32 to vector<8x128xf32>
    %11 = arith.maximumf %9, %10 : vector<8x128xf32>
    %12 = arith.truncf %11 : vector<8x128xf32> to vector<8x128xbf16>
    %c0_9 = arith.constant 0 : index
    %c0_10 = arith.constant 0 : index
    %13 = vector.load %arg4[%c0_9, %c0_10] : memref<128x256xbf16, #tpu.memory_space<vmem>>, vector<128x256xbf16>
    %cst_11 = arith.constant dense<0.000000e+00> : vector<8x256xf32>
    %14 = tpu.matmul %12, %13, %cst_11 {dimension_numbers = #tpu.dot_dimension_numbers<[1], [0], [0], [1], [0, 0, 1, 1], [], []>} : vector<8x128xbf16>, vector<128x256xbf16>, vector<8x256xf32> -> vector<8x256xf32>
    %15 = vector.broadcast %1 : vector<1x256xf32> to vector<8x256xf32>
    %16 = arith.addf %14, %15 : vector<8x256xf32>
    %17 = vector.extract_strided_slice %16 {offsets = [0, 0], sizes = [8, 128], strides = [1, 1]} : vector<8x256xf32> to vector<8x128xf32>
    %18 = vector.extract_strided_slice %16 {offsets = [0, 128], sizes = [8, 128], strides = [1, 1]} : vector<8x256xf32> to vector<8x128xf32>
    %cst_12 = arith.constant 5.000000e-01 : f32
    %19 = vector.broadcast %cst_12 : f32 to vector<8x128xf32>
    %20 = arith.mulf %19, %18 : vector<8x128xf32>
    %21 = math.exp %20 : vector<8x128xf32>
    %c0_13 = arith.constant 0 : index
    %c0_14 = arith.constant 0 : index
    %22 = vector.load %arg2[%c0_13, %c0_14] : memref<8x128xf32, #tpu.memory_space<vmem>>, vector<8x128xf32>
    %23 = arith.mulf %21, %22 : vector<8x128xf32>
    %24 = arith.addf %17, %23 : vector<8x128xf32>
    %25 = arith.truncf %24 : vector<8x128xf32> to vector<8x128xbf16>
    %c0_15 = arith.constant 0 : index
    %c0_16 = arith.constant 0 : index
    %26 = vector.load %arg5[%c0_15, %c0_16] : memref<128x128xbf16, #tpu.memory_space<vmem>>, vector<128x128xbf16>
    %cst_17 = arith.constant dense<0.000000e+00> : vector<8x128xf32>
    %27 = tpu.matmul %25, %26, %cst_17 {dimension_numbers = #tpu.dot_dimension_numbers<[1], [0], [0], [1], [0, 0, 1, 1], [], []>} : vector<8x128xbf16>, vector<128x128xbf16>, vector<8x128xf32> -> vector<8x128xf32>
    %28 = vector.broadcast %2 : vector<1x128xf32> to vector<8x128xf32>
    %29 = arith.addf %27, %28 : vector<8x128xf32>
    %cst_18 = arith.constant 0.000000e+00 : f32
    %30 = vector.broadcast %cst_18 : f32 to vector<8x128xf32>
    %31 = arith.maximumf %29, %30 : vector<8x128xf32>
    %32 = arith.truncf %31 : vector<8x128xf32> to vector<8x128xbf16>
    %c0_19 = arith.constant 0 : index
    %c0_20 = arith.constant 0 : index
    %33 = vector.load %arg6[%c0_19, %c0_20] : memref<128x128xbf16, #tpu.memory_space<vmem>>, vector<128x128xbf16>
    %cst_21 = arith.constant dense<0.000000e+00> : vector<8x128xf32>
    %34 = tpu.matmul %32, %33, %cst_21 {dimension_numbers = #tpu.dot_dimension_numbers<[1], [0], [0], [1], [0, 0, 1, 1], [], []>} : vector<8x128xbf16>, vector<128x128xbf16>, vector<8x128xf32> -> vector<8x128xf32>
    %35 = vector.broadcast %3 : vector<1x128xf32> to vector<8x128xf32>
    %36 = arith.addf %34, %35 : vector<8x128xf32>
    %cst_22 = arith.constant 0.000000e+00 : f32
    %37 = vector.broadcast %cst_22 : f32 to vector<8x128xf32>
    %38 = arith.subf %37, %36 : vector<8x128xf32>
    %39 = math.exp %38 : vector<8x128xf32>
    %cst_23 = arith.constant 1.000000e+00 : f32
    %40 = vector.broadcast %cst_23 : f32 to vector<8x128xf32>
    %41 = arith.addf %40, %39 : vector<8x128xf32>
    %42 = tpu.reciprocal %41 {approx = true} : vector<8x128xf32> -> vector<8x128xf32>
    %c0_24 = arith.constant 0 : index
    %c0_25 = arith.constant 0 : index
    %43 = vector.load %arg8[%c0_24, %c0_25] : memref<8x128xf32, #tpu.memory_space<vmem>>, vector<8x128xf32>
    tpu.vector_store %arg8[%c0_24, %c0_25], %42 {strides = array<i32>} : memref<8x128xf32, #tpu.memory_space<vmem>>, vector<8x128xf32>,
    %c0_26 = arith.constant 0 : index
    %c0_27 = arith.constant 0 : index
    %44 = vector.load %arg9[%c0_26, %c0_27] : memref<8x256xf32, #tpu.memory_space<vmem>>, vector<8x256xf32>
    tpu.vector_store %arg9[%c0_26, %c0_27], %16 {strides = array<i32>} : memref<8x256xf32, #tpu.memory_space<vmem>>, vector<8x256xf32>,
    return
  }
  func.func @transform_0(%arg0: i32) -> (i32, i32) {
    %c0_i32 = arith.constant 0 : i32
    %c0_i32_0 = arith.constant 0 : i32
    return %arg0, %c0_i32 : i32, i32
  }
  func.func @transform_1(%arg0: i32) -> (i32, i32) {
    %c0_i32 = arith.constant 0 : i32
    %c0_i32_0 = arith.constant 0 : i32
    return %arg0, %c0_i32 : i32, i32
  }
  func.func @transform_2(%arg0: i32) -> (i32, i32) {
    %c0_i32 = arith.constant 0 : i32
    %c0_i32_0 = arith.constant 0 : i32
    %c0_i32_1 = arith.constant 0 : i32
    return %c0_i32, %c0_i32_0 : i32, i32
  }
  func.func @transform_3(%arg0: i32) -> (i32, i32) {
    %c0_i32 = arith.constant 0 : i32
    %c0_i32_0 = arith.constant 0 : i32
    %c0_i32_1 = arith.constant 0 : i32
    return %c0_i32, %c0_i32_0 : i32, i32
  }
  func.func @transform_4(%arg0: i32) -> (i32, i32) {
    %c0_i32 = arith.constant 0 : i32
    %c0_i32_0 = arith.constant 0 : i32
    %c0_i32_1 = arith.constant 0 : i32
    return %c0_i32, %c0_i32_0 : i32, i32
  }
  func.func @transform_5(%arg0: i32) -> (i32, i32) {
    %c0_i32 = arith.constant 0 : i32
    %c0_i32_0 = arith.constant 0 : i32
    %c0_i32_1 = arith.constant 0 : i32
    return %c0_i32, %c0_i32_0 : i32, i32
  }
  func.func @transform_6(%arg0: i32) -> (i32, i32) {
    %c0_i32 = arith.constant 0 : i32
    %c0_i32_0 = arith.constant 0 : i32
    %c0_i32_1 = arith.constant 0 : i32
    return %c0_i32, %c0_i32_0 : i32, i32
  }
  func.func @transform_7(%arg0: i32) -> (i32, i32) {
    %c0_i32 = arith.constant 0 : i32
    %c0_i32_0 = arith.constant 0 : i32
    return %arg0, %c0_i32 : i32, i32
  }
  func.func @transform_8(%arg0: i32) -> (i32, i32) {
    %c0_i32 = arith.constant 0 : i32
    %c0_i32_0 = arith.constant 0 : i32
    return %arg0, %c0_i32 : i32, i32
  }
}

</mosaic_0001>

<bundles_post_ra>
// kernel: vae_forward.1
= control target key start
LH: loop header
LB: loop body
LE: loop exit
PB: predicated region body
PF: predicated region fallthrough
CT: control target
= control target key end

     0   :  { %v759_v1 = vmov 0.0   ;;  %vm760_vm0 = vmmov 0   ;;  %s994_s0 = inlined_call_operand.vmem [shape: f32[8,128], index: 0, kind: input, shape index: {}]   ;;  %s995_s1 = inlined_call_operand.vmem [shape: f32[8,128], index: 1, kind: input, shape index: {}]   ;;  %s996_s2 = inlined_call_operand.vmem [shape: bf16[128,128], index: 2, kind: input, shape index: {}]   ;;  %s997_s3 = inlined_call_operand.vmem [shape: bf16[128,256], index: 3, kind: input, shape index: {}]   ;;  %s998_s4 = inlined_call_operand.vmem [shape: bf16[128,128], index: 4, kind: input, shape index: {}]   ;;  %s999_s5 = inlined_call_operand.vmem [shape: bf16[128,128], index: 5, kind: input, shape index: {}]   ;;  %s1000_s6 = inlined_call_operand.vmem [shape: f32[4,256], index: 6, kind: input, shape index: {}]   ;;  %s1001_s7 = inlined_call_operand.hbm [shape: f32[8,128], index: 7, kind: output, shape index: {0}]   ;;  %s1002_s8 = inlined_call_operand.vmem [shape: f32[8,256], index: 8, kind: output, shape index: {1}]  }
   0x1   :  { %v681_v0 = vld [vmem:[%s996_s2] sm:$0xff]   ;;  %617 = vmatprep.subr.bf16.mxu0 %v759_v1  ;;  %v682_v2 = vld [vmem:[%s996_s2 + $0x8] sm:$0xff]   ;;  %633 = vmatprep.mubr.msk.bf16.mxu0 %vm760_vm0, %v759_v1  ;;  %v683_v3 = vld [vmem:[%s996_s2 + $0x10] sm:$0xff]  }
   0x2   :  { %618 = vmatpush3.bf16.msra.mxu0 %v681_v0  ;;  %v689_v4 = vld [vmem:[%s997_s3 + $0x4] ss:$8 sps:$4 sm:$0xff]   ;;  %v691_v5 = vld [vmem:[%s997_s3] ss:$8 sps:$4 sm:$0xff]   ;;  %v684_v6 = vld [vmem:[%s996_s2 + $0x18] sm:$0xff]  }
   0x3   :  { %619 = vmatprep.subr.bf16.mxu0 %v759_v1  ;;  %v692_v7 = vld [vmem:[%s997_s3 + $0x14] ss:$8 sps:$4 sm:$0xff]   ;;  %254 = vmatprep.subr.bf16.mxu1 %v689_v4  ;;  %v694_v8 = vld [vmem:[%s997_s3 + $0x10] ss:$8 sps:$4 sm:$0xff]   ;;  %v695_v9 = vld [vmem:[%s997_s3 + $0x24] ss:$8 sps:$4 sm:$0xff]  }
   0x4   :  { %255 = vmatpush1.bf16.msra.mxu1 %v691_v5  ;;  %v685_v10 = vld [vmem:[%s996_s2 + $0x20] sm:$0xff]   ;;  %v686_v12 = vld [vmem:[%s996_s2 + $0x28] sm:$0xff]   ;;  %v698_v13 = vld [vmem:[%s997_s3 + $0x34] ss:$8 sps:$4 sm:$0xff]  }
   0x5   :  { %256 = vmatprep.subr.bf16.mxu1 %v692_v7  ;;  %v697_v11 = vld [vmem:[%s997_s3 + $0x20] ss:$8 sps:$4 sm:$0xff]   ;;  %v700_v14 = vld [vmem:[%s997_s3 + $0x30] ss:$8 sps:$4 sm:$0xff]   ;;  %v701_v15 = vld [vmem:[%s997_s3 + $0x44] ss:$8 sps:$4 sm:$0xff]  }
   0x6   :  { %620 = vmatpush3.bf16.msra.mxu0 %v682_v2  ;;  %v687_v16 = vld [vmem:[%s996_s2 + $0x30] sm:$0xff]   ;;  %v703_v17 = vld [vmem:[%s997_s3 + $0x40] ss:$8 sps:$4 sm:$0xff]   ;;  %v688_v19 = vld [vmem:[%s996_s2 + $0x38] sm:$0xff]  }
   0x7   :  { %621 = vmatprep.subr.bf16.mxu0 %v759_v1  ;;  %v704_v18 = vld [vmem:[%s997_s3 + $0x54] ss:$8 sps:$4 sm:$0xff]   ;;  %v35_v20 = vld [vmem:[%s994_s0] sm:$0xff]  ;;  %v706_v21 = vld [vmem:[%s997_s3 + $0x50] ss:$8 sps:$4 sm:$0xff]  }
   0x8   :  { %257 = vmatpush1.bf16.msra.mxu1 %v694_v8  ;;  %v36_v22 = vpack.c.bf16 %v35_v20, %v35_v20  ;;  %v707_v23 = vld [vmem:[%s997_s3 + $0x64] ss:$8 sps:$4 sm:$0xff]  }
   0x9   :  { %258 = vmatprep.subr.bf16.mxu1 %v695_v9 }
   0xa   :  { %622 = vmatpush3.bf16.msra.mxu0 %v683_v3 }
   0xb   :  { %623 = vmatprep.subr.bf16.mxu0 %v759_v1 }
   0xc   :  { %259 = vmatpush1.bf16.msra.mxu1 %v697_v11 }
   0xd   :  { %260 = vmatprep.subr.bf16.mxu1 %v698_v13 }
   0xe   :  { %624 = vmatpush3.bf16.msra.mxu0 %v684_v6 }
   0xf   :  { %625 = vmatprep.subr.bf16.mxu0 %v759_v1 }
  0x10   :  { %261 = vmatpush1.bf16.msra.mxu1 %v700_v14 }
  0x11   :  { %262 = vmatprep.subr.bf16.mxu1 %v701_v15 }
  0x12   :  { %626 = vmatpush3.bf16.msra.mxu0 %v685_v10 }
  0x13   :  { %627 = vmatprep.subr.bf16.mxu0 %v759_v1 }
  0x14   :  { %263 = vmatpush1.bf16.msra.mxu1 %v703_v17 }
  0x15   :  { %264 = vmatprep.subr.bf16.mxu1 %v704_v18 }
  0x16   :  { %628 = vmatpush3.bf16.msra.mxu0 %v686_v12 }
  0x17   :  { %629 = vmatprep.subr.bf16.mxu0 %v759_v1 }
  0x1a   :  { %630 = vmatpush3.bf16.msra.mxu0 %v687_v16 }
  0x1b   :  { %631 = vmatprep.subr.bf16.mxu0 %v759_v1 }
  0x1c   :  { %14 = vsyncpa [#allocation3], 0  ;;  %265 = vmatpush1.bf16.msra.mxu1 %v706_v21  ;;  %v709_v24 = vld [vmem:[%s997_s3 + $0x60] ss:$8 sps:$4 sm:$0xff]   ;;  %v710_v25 = vld [vmem:[%s997_s3 + $0x74] ss:$8 sps:$4 sm:$0xff]   ;;  %v164_v50 = vlaneseq }
  0x1d   :  { %266 = vmatprep.subr.bf16.mxu1 %v707_v23  ;;  %v712_v26 = vld [vmem:[%s997_s3 + $0x70] ss:$8 sps:$4 sm:$0xff]   ;;  %v761_v27 = vmov 0   ;;  %v713_v28 = vld [vmem:[%s998_s4] sm:$0xff]   ;;  %v714_v29 = vld [vmem:[%s998_s4 + $0x8] sm:$0xff]  }
  0x1e   :  { %632 = vmatpush3.bf16.msra.mxu0 %v688_v19  ;;  %286 = vmatprep.mubr.bf16.mxu1 %v761_v27  ;;  %v547_v30 = vld [vmem:[%s1000_s6] ss:$0 sm:$0xff]  ;;  %v715_v38 = vld [vmem:[%s998_s4 + $0x10] sm:$0xff]   ;;  %v716_v39 = vld [vmem:[%s998_s4 + $0x18] sm:$0xff]   ;;  %v165_v51 = vshrl.u32 %v164_v50, 7 }
  0x1f   :  { %637 = vmatprep.subr.bf16.mxu0 %v759_v1  ;;  %v717_v40 = vld [vmem:[%s998_s4 + $0x20] sm:$0xff]   ;;  %v718_v41 = vld [vmem:[%s998_s4 + $0x28] sm:$0xff]   ;;  %v719_v42 = vld [vmem:[%s998_s4 + $0x30] sm:$0xff]  }
  0x20   :  { %267 = vmatpush1.bf16.msra.mxu1 %v709_v24  ;;  %v720_v43 = vld [vmem:[%s998_s4 + $0x38] sm:$0xff]   ;;  %v721_v44 = vld [vmem:[%s999_s5] sm:$0xff]   ;;  %v722_v45 = vld [vmem:[%s999_s5 + $0x8] sm:$0xff]   ;;  %v166_v52 = vsub.s32 0, %v165_v51  ;;  %v170_v54 = vsub.s32 1, %v165_v51 }
  0x21   :  { %634 = vmatmul.mubr.bf16.vlgmr.msra.gmra.mrb[0].mxu0 %v36_v22  ;;  %268 = vmatprep.subr.bf16.mxu1 %v710_v25  ;;  %v723_v46 = vld [vmem:[%s999_s5 + $0x10] sm:$0xff]   ;;  %v724_v47 = vld [vmem:[%s999_s5 + $0x18] sm:$0xff]   ;;  %v725_v48 = vld [vmem:[%s999_s5 + $0x20] sm:$0xff]  }
  0x22   :  { %653 = vmatprep.mubr.msk.bf16.mxu0 %vm760_vm0, %v759_v1  ;;  %638 = vmatpush3.bf16.msra.mxu0 %v713_v28  ;;  %v726_v49 = vld [vmem:[%s999_s5 + $0x28] sm:$0xff]   ;;  %v546_v53 = vld [vmem:[%s1000_s6 + $0x1] ss:$4 sm:$0x3]  ;;  %v727_v7 = vld [vmem:[%s999_s5 + $0x30] sm:$0xff]  }
  0x23   :  { %639 = vmatprep.subr.bf16.mxu0 %v759_v1  ;;  %v167_v55 = vrot.slane %v546_v53, %v166_v52  ;;  %v171_v56 = vrot.slane %v546_v53, %v170_v54  ;;  %v298_v2 = vld [vmem:[%s995_s1] sm:$0xff]  ;;  %v728_v8 = vld [vmem:[%s999_s5 + $0x38] sm:$0xff]   ;;  %s762_s5 = smov [#allocation2]  }
  0x24   :  { %269 = vmatpush1.bf16.msra.mxu1 %v712_v26  ;;  %v572_v9 = vld [vmem:[%s1000_s6 + $0x2] ss:$0 sm:$0xff]  ;;  %s534_s26 = sshll.u32 %s762_s5, 4  ;;  %s535_s26 = int_to_ptr.vmem [resolvable:$true] %s534_s26 }
  0x25   :  { %657 = vmatprep.subr.bf16.mxu1 %v759_v1  ;;  %s735_s0 = scalar_lea.vmem %s535_s26, 128  ;;  %p740_p1 = scmp.lt.s32.totalorder %s535_s26, %s535_s26 }
  0x26   :  { %640 = vmatpush3.bf16.msra.mxu0 %v714_v29  ;;  %p736_p0 = scmp.ne.s32.totalorder %s535_s26, %s735_s0  ;;  %p741_p2 = scmp.lt.s32.totalorder %s735_s0, %s735_s0 }
  0x27   :  { %641 = vmatprep.subr.bf16.mxu0 %v759_v1 }
  0x28   :  { %p742_p3 = por %p741_p2, %p740_p1 }
  0x2a   :  { %642 = vmatpush3.bf16.msra.mxu0 %v715_v38  ;;  %p743_p4 = pnand %p742_p3, %p736_p0 }
  0x2b   :  { %643 = vmatprep.subr.bf16.mxu0 %v759_v1 }
  0x2e   :  { %644 = vmatpush3.bf16.msra.mxu0 %v716_v39 }
  0x2f   :  { %645 = vmatprep.subr.bf16.mxu0 %v759_v1 }
  0x32   :  { %646 = vmatpush3.bf16.msra.mxu0 %v717_v40 }
  0x33   :  { %647 = vmatprep.subr.bf16.mxu0 %v759_v1 }
  0x36   :  { %648 = vmatpush3.bf16.msra.mxu0 %v718_v41 }
  0x37   :  { %649 = vmatprep.subr.bf16.mxu0 %v759_v1 }
  0x3a   :  { %650 = vmatpush3.bf16.msra.mxu0 %v719_v42 }
  0x3b   :  { %651 = vmatprep.subr.bf16.mxu0 %v759_v1 }
  0x3e   :  { %652 = vmatpush3.bf16.msra.mxu0 %v720_v43 }
  0xf4   :  { %v139_v31 = vpop.f32.mrb[0].mxu0 }
  0xf5   :  { %v140_v32 = vadd.f32 %v547_v30, %v139_v31  ;;  %v635_v33 = vpop.f32.mrb[1].mxu0 }
  0xf6   :  { %v142_v34 = vpop.f32.mrb[2].mxu0 }
  0xf7   :  { %v145_v35 = vmax.f32 %v140_v32, 0.0  ;;  %v636_v36 = vpop.f32.mrb[3].mxu0 }
  0xf9   :  { %v146_v37 = vpack.c.bf16 %v145_v35, %v145_v35 }
  0xfb   :  { %287 = vmatmul.mubr.bf16.vlgmr.msra.gmra.mrb[0].mxu1 %v146_v37 }
  0xfc   :  { %673 = vmatprep.mubr.msk.bf16.mxu1 %vm760_vm0, %v759_v1  ;;  %658 = vmatpush3.bf16.msra.mxu1 %v721_v44 }
  0xfd   :  { %659 = vmatprep.subr.bf16.mxu1 %v759_v1 }
 0x100   :  { %660 = vmatpush3.bf16.msra.mxu1 %v722_v45 }
 0x101   :  { %661 = vmatprep.subr.bf16.mxu1 %v759_v1 }
 0x104   :  { %662 = vmatpush3.bf16.msra.mxu1 %v723_v46 }
 0x105   :  { %663 = vmatprep.subr.bf16.mxu1 %v759_v1 }
 0x108   :  { %664 = vmatpush3.bf16.msra.mxu1 %v724_v47 }
 0x109   :  { %665 = vmatprep.subr.bf16.mxu1 %v759_v1 }
 0x10c   :  { %666 = vmatpush3.bf16.msra.mxu1 %v725_v48 }
 0x10d   :  { %667 = vmatprep.subr.bf16.mxu1 %v759_v1 }
 0x110   :  { %668 = vmatpush3.bf16.msra.mxu1 %v726_v49 }
 0x111   :  { %669 = vmatprep.subr.bf16.mxu1 %v759_v1 }
 0x114   :  { %670 = vmatpush3.bf16.msra.mxu1 %v727_v7 }
 0x115   :  { %671 = vmatprep.subr.bf16.mxu1 %v759_v1  ;;  %v581_v1 = vld [vmem:[%s1000_s6 + $0x3] ss:$0 sm:$0xff] }
 0x118   :  { %672 = vmatpush3.bf16.msra.mxu1 %v728_v8 }
 0x1ce   :  { %v288_v57 = vpop.f32.mrb[0].mxu1 }
 0x1cf   :  { %v289_v58 = vadd.f32 %v288_v57, %v167_v55  ;;  %v290_v59 = vpop.f32.mrb[1].mxu1 }
 0x1d0   :  { %v291_v60 = vadd.f32 %v290_v59, %v171_v56  ;;  %v292_v61 = vpop.f32.mrb[2].mxu1 }
 0x1d1   :  { %526 = vst [vmem:[%s1002_s8] sm:$0xff] %v289_v58  ;;  %v293_v62 = vpop.f32.mrb[3].mxu1 }
 0x1d2   :  { %v295_v63 = vmul.f32 0.5, %v291_v60  ;;  %527 = vst [vmem:[%s1002_s8 + $0x8] sm:$0xff] %v291_v60 }
 0x1d4   :  { %v296_v0 = vmul.f32 1.442695, %v295_v63 }
 0x1d6   :  { %729 = vpow2.f32 %v296_v0 }
 0x1e0   :  { %v730_v3 = vpop.eup %729 }
 0x1e1   :  { %v299_v4 = vmul.f32 %v730_v3, %v298_v2 }
 0x1e3   :  { %v300_v5 = vadd.f32 %v299_v4, %v289_v58 }
 0x1e5   :  { %v301_v6 = vpack.c.bf16 %v300_v5, %v300_v5 }
 0x1e7   :  { %654 = vmatmul.mubr.bf16.vlgmr.msra.gmra.mrb[4].mxu0 %v301_v6 }
 0x2ba   :  { %v404_v10 = vpop.f32.mrb[4].mxu0 }
 0x2bb   :  { %v405_v11 = vadd.f32 %v572_v9, %v404_v10  ;;  %v655_v12 = vpop.f32.mrb[5].mxu0 }
 0x2bc   :  { %v407_v13 = vpop.f32.mrb[6].mxu0 }
 0x2bd   :  { %v410_v14 = vmax.f32 %v405_v11, 0.0  ;;  %v656_v15 = vpop.f32.mrb[7].mxu0 }
 0x2bf   :  { %v411_v16 = vpack.c.bf16 %v410_v14, %v410_v14 }
 0x2c1   :  { %674 = vmatmul.mubr.bf16.vlgmr.msra.gmra.mrb[4].mxu1 %v411_v16 }
 0x394   :  { %v514_v17 = vpop.f32.mrb[4].mxu1 }
 0x395   :  { %v515_v18 = vadd.f32 %v581_v1, %v514_v17  ;;  %v675_v19 = vpop.f32.mrb[5].mxu1 }
 0x396   :  { %v517_v20 = vpop.f32.mrb[6].mxu1 }
 0x397   :  { %v520_v21 = vsub.f32 0.0, %v515_v18  ;;  %v676_v22 = vpop.f32.mrb[7].mxu1 }
 0x399   :  { %v521_v23 = vmul.f32 1.442695, %v520_v21 }
 0x39b   :  { %731 = vpow2.f32 %v521_v23 }
 0x3a5   :  { %v732_v24 = vpop.eup %731 }
 0x3a6   :  { %v523_v25 = vadd.f32 1.0, %v732_v24 }
 0x3a8   :  { %733 = vrcp.f32 %v523_v25 }
 0x3b2   :  { %v734_v26 = vpop.eup %733 }
 0x3b3   :  { %525 = vst [vmem:[#allocation2] sm:$0xff] %v734_v26 }
 0x3b4   :  { %746 = shalt.err (!%p743_p4)
}
 0x3b5   :  { %s747_s27 = scalar_lea.hbm %s1001_s7, 128 }
 0x3b6   :  { %p748_p5 = scmp.ne.s32.totalorder %s1001_s7, %s747_s27  ;;  %p751_p6 = scmp.lt.u32.totalorder %s747_s27, %s1001_s7 }
 0x3b8   :  { %p753_p7 = pnand %p751_p6, %p748_p5 }
 0x3ba   :  { %756 = shalt.err (!%p753_p7)
}
 0x3bb   :  { %537 = dma.vmem_to_hbm [thread:$0]  %s535_s26, 128, %s1001_s7, [#allocation3]  }
 0x3bc   :  { %757 = dma.done.wait [#allocation3], 128  }
 0x3bd   :  { %758 = vsyncadd [#allocation3], 4294967168 }
 0x3be   :  { %545 = vsyncpa [#allocation3], 1 }

</bundles_post_ra>
